<compile_context>
chip_gen: v5e
topology: v5e:2x2
jax: 0.10.0
libtpu: 0.0.40
codegen_flags: <defaults>
</compile_context>

<pallas_src>
import jax
import jax.numpy as jnp
from jax import lax
from jax.experimental import pallas as pl
from jax.experimental.pallas import tpu as pltpu


def _reward_mlp_kernel(s_ref, a_ref, sn_ref,
                       w1s_ref, w1a_ref, w1sn_ref, b1_ref,
                       w2_ref, b2_ref, w3t_ref, b3_ref, o_ref):
    # Layer 1: split-W1 form -> the concatenated [s, a, s_next] is never built.
    h1 = (jnp.dot(s_ref[...], w1s_ref[...], preferred_element_type=jnp.float32)
          + jnp.dot(a_ref[...], w1a_ref[...], preferred_element_type=jnp.float32)
          + jnp.dot(sn_ref[...], w1sn_ref[...], preferred_element_type=jnp.float32)
          + b1_ref[...])
    h1 = jnp.maximum(h1, 0.0)                                # torch.relu

    # Layer 2.
    h2 = jnp.dot(h1, w2_ref[...], preferred_element_type=jnp.float32) + b2_ref[...]
    h2 = jnp.maximum(h2, 0.0)                                # torch.relu

    # Layer 3, transposed: [1, H2] . [block_b, H2]^T -> [1, block_b].
    # Output is lane-dense (batch on the 128-lane axis), so the store is an
    # unmasked vst and the MXU sees N = block_b instead of N = 1.
    out = lax.dot_general(w3t_ref[...], h2, (((1,), (1,)), ((), ())),
                          preferred_element_type=jnp.float32) + b3_ref[...]
    o_ref[...] = out.astype(o_ref.dtype)                     # [1, block_b]


def reward_net_mlp_forward(s, a, s_next, params, *, block_b=None):
    """Pallas implementation of RewardNetMLP.forward.

    s:      [B, state_dim]
    a:      [B, act_dim]
    s_next: [B, state_dim]
    returns [B, 1]
    """
    assert s.ndim == a.ndim, "State and action inputs should be of the same size"
    B, S = s.shape
    A = a.shape[-1]
    w1, b1, w2, b2, w3, b3 = params
    D_in = 2 * S + A
    assert w1.shape[0] == D_in, (w1.shape, D_in)
    H1, H2 = w1.shape[1], w2.shape[1]

    # Static, tiny parameter reshuffles (one-time; replaces the per-call concat).
    w1_s = w1[:S]                 # [S,  H1]
    w1_a = w1[S:S + A]            # [A,  H1]
    w1_sn = w1[S + A:]            # [S,  H1]
    w3t = w3.T                    # [1,  H2]

    if block_b is None:
        # Multiple grid steps for large B (pipelining + v7x dual-core), while
        # each block stays well under a few MB of VMEM on every chip.
        block_b = B if B <= 1024 else 1024
    if block_b != B:
        assert block_b % 128 == 0, "block_b must be a multiple of 128 or equal to B"
    grid = (pl.cdiv(B, block_b),)

    def full(arr):
        # Constant index_map -> parameter tile stays resident in VMEM.
        return pl.BlockSpec(arr.shape, lambda i: (0,) * arr.ndim)

    flops = 2 * B * (D_in * H1 + H1 * H2 + H2)
    bytes_accessed = 4 * (B * (D_in + 1)
                          + (D_in + 1) * H1 + (H1 + 1) * H2 + (H2 + 1))
    cost = pl.CostEstimate(flops=flops, transcendentals=0,
                           bytes_accessed=bytes_accessed)

    out_t = pl.pallas_call(
        _reward_mlp_kernel,
        out_shape=jax.ShapeDtypeStruct((1, B), jnp.float32),
        grid_spec=pltpu.PrefetchScalarGridSpec(
            num_scalar_prefetch=0,
            grid=grid,
            in_specs=[
                pl.BlockSpec((block_b, S), lambda i: (i, 0)),   # s tile
                pl.BlockSpec((block_b, A), lambda i: (i, 0)),   # a tile
                pl.BlockSpec((block_b, S), lambda i: (i, 0)),   # s_next tile
                full(w1_s), full(w1_a), full(w1_sn), full(b1),  # layer 1
                full(w2), full(b2),                             # layer 2
                full(w3t), full(b3),                            # layer 3 (transposed)
            ],
            out_specs=pl.BlockSpec((1, block_b), lambda i: (0, i)),  # lane-dense
        ),
        compiler_params=pltpu.CompilerParams(
            dimension_semantics=("parallel",),
        ),
        cost_estimate=cost,
    )(s, a, s_next, w1_s, w1_a, w1_sn, b1, w2, b2, w3t, b3)

    return out_t.reshape(B, 1)


def init_reward_net_params(key, state_dim, act_dim, hidden_size=(64, 64)):
    """Deterministic init matching nn.Linear's U(-1/sqrt(fan_in), 1/sqrt(fan_in))."""
    d_in = state_dim + act_dim + state_dim
    dims = (d_in,) + tuple(hidden_size) + (1,)
    params = []
    for i in range(len(dims) - 1):
        fan_in, fan_out = dims[i], dims[i + 1]
        key, kw, kb = jax.random.split(key, 3)
        bound = 1.0 / jnp.sqrt(float(fan_in))
        w = jax.random.uniform(kw, (fan_in, fan_out), jnp.float32, -bound, bound)
        b = jax.random.uniform(kb, (1, fan_out), jnp.float32, -bound, bound)
        params += [w, b]
    return tuple(params)


def _reference_forward(s, a, s_next, params):
    # Pure-JAX reference for correctness checking.
    x = jnp.concatenate([s, a, s_next], axis=-1)
    w1, b1, w2, b2, w3, b3 = params
    h1 = jnp.maximum(x @ w1 + b1, 0.0)
    h2 = jnp.maximum(h1 @ w2 + b2, 0.0)
    return h2 @ w3 + b3


if __name__ == "__main__":
    key = jax.random.PRNGKey(0)

    batch, state_dim, act_dim = 8, 4, 2
    hidden_size = (64, 64)

    k_params, k_s, k_a, k_sn = jax.random.split(key, 4)
    params = init_reward_net_params(k_params, state_dim, act_dim, hidden_size)

    # Small-shape check (single grid step, block_b == B).
    s = jax.random.normal(k_s, (batch, state_dim), jnp.float32)
    a = jax.random.normal(k_a, (batch, act_dim), jnp.float32)
    s_next = jax.random.normal(k_sn, (batch, state_dim), jnp.float32)

    out = reward_net_mlp_forward(s, a, s_next, params)
    out = jax.block_until_ready(out)
    ref = _reference_forward(s, a, s_next, params)
    assert out.shape == (batch, 1), out.shape
    assert jnp.allclose(out, ref, atol=1e-5, rtol=1e-5), (
        f"max abs err {jnp.max(jnp.abs(out - ref))}"
    )

    # Multi-block check: exercises the tiled, lane-dense output path (grid=(2,)).
    B2 = 256
    k_s2, k_a2, k_sn2 = jax.random.split(jax.random.PRNGKey(1), 3)
    s2 = jax.random.normal(k_s2, (B2, state_dim), jnp.float32)
    a2 = jax.random.normal(k_a2, (B2, act_dim), jnp.float32)
    sn2 = jax.random.normal(k_sn2, (B2, state_dim), jnp.float32)
    out2 = jax.block_until_ready(
        reward_net_mlp_forward(s2, a2, sn2, params, block_b=128))
    ref2 = _reference_forward(s2, a2, sn2, params)
    assert out2.shape == (B2, 1), out2.shape
    assert jnp.allclose(out2, ref2, atol=1e-5, rtol=1e-5), (
        f"max abs err {jnp.max(jnp.abs(out2 - ref2))}"
    )

    print("KERNEL_OK")
</pallas_src>

<mosaic_0001>
module attributes {stable_mosaic.version = 11 : i64} {
  func.func @_reward_mlp_kernel(%arg0: i32, %arg1: memref<8x4xf32, #tpu.memory_space<vmem>>, %arg2: memref<8x2xf32, #tpu.memory_space<vmem>>, %arg3: memref<8x4xf32, #tpu.memory_space<vmem>>, %arg4: memref<4x64xf32, #tpu.memory_space<vmem>>, %arg5: memref<2x64xf32, #tpu.memory_space<vmem>>, %arg6: memref<4x64xf32, #tpu.memory_space<vmem>>, %arg7: memref<1x64xf32, #tpu.memory_space<vmem>>, %arg8: memref<64x64xf32, #tpu.memory_space<vmem>>, %arg9: memref<1x64xf32, #tpu.memory_space<vmem>>, %arg10: memref<1x64xf32, #tpu.memory_space<vmem>>, %arg11: memref<1x1xf32, #tpu.memory_space<vmem>>, %arg12: memref<1x8xf32, #tpu.memory_space<vmem>>) attributes {dimension_semantics = [#tpu.dimension_semantics<parallel>], iteration_bounds = array<i64: 1>, scalar_prefetch = 0 : i64, scratch_operands = 0 : i64, tpu.core_type = #tpu.core_type<tc>, window_params = [{transform_indices = @transform_0, window_bounds = array<i64: 8, 4>}, {transform_indices = @transform_1, window_bounds = array<i64: 8, 2>}, {transform_indices = @transform_2, window_bounds = array<i64: 8, 4>}, {pipeline_mode = #tpu.pipeline_mode<synchronous>, transform_indices = @transform_3, window_bounds = array<i64: 4, 64>}, {pipeline_mode = #tpu.pipeline_mode<synchronous>, transform_indices = @transform_4, window_bounds = array<i64: 2, 64>}, {pipeline_mode = #tpu.pipeline_mode<synchronous>, transform_indices = @transform_5, window_bounds = array<i64: 4, 64>}, {pipeline_mode = #tpu.pipeline_mode<synchronous>, transform_indices = @transform_6, window_bounds = array<i64: 1, 64>}, {pipeline_mode = #tpu.pipeline_mode<synchronous>, transform_indices = @transform_7, window_bounds = array<i64: 64, 64>}, {pipeline_mode = #tpu.pipeline_mode<synchronous>, transform_indices = @transform_8, window_bounds = array<i64: 1, 64>}, {pipeline_mode = #tpu.pipeline_mode<synchronous>, transform_indices = @transform_9, window_bounds = array<i64: 1, 64>}, {pipeline_mode = #tpu.pipeline_mode<synchronous>, transform_indices = @transform_10, window_bounds = array<i64: 1, 1>}, {transform_indices = @transform_11, window_bounds = array<i64: 1, 8>}]} {
    %c0 = arith.constant 0 : index
    %c0_0 = arith.constant 0 : index
    %0 = vector.load %arg1[%c0, %c0_0] : memref<8x4xf32, #tpu.memory_space<vmem>>, vector<8x4xf32>
    %c0_1 = arith.constant 0 : index
    %c0_2 = arith.constant 0 : index
    %1 = vector.load %arg4[%c0_1, %c0_2] : memref<4x64xf32, #tpu.memory_space<vmem>>, vector<4x64xf32>
    %cst = arith.constant dense<0.000000e+00> : vector<8x64xf32>
    %2 = tpu.matmul %0, %1, %cst {dimension_numbers = #tpu.dot_dimension_numbers<[1], [0], [0], [1], [0, 0, 1, 1], [], []>} : vector<8x4xf32>, vector<4x64xf32>, vector<8x64xf32> -> vector<8x64xf32>
    %c0_3 = arith.constant 0 : index
    %c0_4 = arith.constant 0 : index
    %3 = vector.load %arg2[%c0_3, %c0_4] : memref<8x2xf32, #tpu.memory_space<vmem>>, vector<8x2xf32>
    %c0_5 = arith.constant 0 : index
    %c0_6 = arith.constant 0 : index
    %4 = vector.load %arg5[%c0_5, %c0_6] : memref<2x64xf32, #tpu.memory_space<vmem>>, vector<2x64xf32>
    %cst_7 = arith.constant dense<0.000000e+00> : vector<8x64xf32>
    %5 = tpu.matmul %3, %4, %cst_7 {dimension_numbers = #tpu.dot_dimension_numbers<[1], [0], [0], [1], [0, 0, 1, 1], [], []>} : vector<8x2xf32>, vector<2x64xf32>, vector<8x64xf32> -> vector<8x64xf32>
    %6 = arith.addf %2, %5 : vector<8x64xf32>
    %c0_8 = arith.constant 0 : index
    %c0_9 = arith.constant 0 : index
    %7 = vector.load %arg3[%c0_8, %c0_9] : memref<8x4xf32, #tpu.memory_space<vmem>>, vector<8x4xf32>
    %c0_10 = arith.constant 0 : index
    %c0_11 = arith.constant 0 : index
    %8 = vector.load %arg6[%c0_10, %c0_11] : memref<4x64xf32, #tpu.memory_space<vmem>>, vector<4x64xf32>
    %cst_12 = arith.constant dense<0.000000e+00> : vector<8x64xf32>
    %9 = tpu.matmul %7, %8, %cst_12 {dimension_numbers = #tpu.dot_dimension_numbers<[1], [0], [0], [1], [0, 0, 1, 1], [], []>} : vector<8x4xf32>, vector<4x64xf32>, vector<8x64xf32> -> vector<8x64xf32>
    %10 = arith.addf %6, %9 : vector<8x64xf32>
    %c0_13 = arith.constant 0 : index
    %c0_14 = arith.constant 0 : index
    %11 = vector.load %arg7[%c0_13, %c0_14] : memref<1x64xf32, #tpu.memory_space<vmem>>, vector<1x64xf32>
    %12 = vector.broadcast %11 : vector<1x64xf32> to vector<8x64xf32>
    %13 = arith.addf %10, %12 : vector<8x64xf32>
    %cst_15 = arith.constant 0.000000e+00 : f32
    %14 = vector.broadcast %cst_15 : f32 to vector<8x64xf32>
    %15 = arith.maximumf %13, %14 : vector<8x64xf32>
    %c0_16 = arith.constant 0 : index
    %c0_17 = arith.constant 0 : index
    %16 = vector.load %arg8[%c0_16, %c0_17] : memref<64x64xf32, #tpu.memory_space<vmem>>, vector<64x64xf32>
    %cst_18 = arith.constant dense<0.000000e+00> : vector<8x64xf32>
    %17 = tpu.matmul %15, %16, %cst_18 {dimension_numbers = #tpu.dot_dimension_numbers<[1], [0], [0], [1], [0, 0, 1, 1], [], []>} : vector<8x64xf32>, vector<64x64xf32>, vector<8x64xf32> -> vector<8x64xf32>
    %c0_19 = arith.constant 0 : index
    %c0_20 = arith.constant 0 : index
    %18 = vector.load %arg9[%c0_19, %c0_20] : memref<1x64xf32, #tpu.memory_space<vmem>>, vector<1x64xf32>
    %19 = vector.broadcast %18 : vector<1x64xf32> to vector<8x64xf32>
    %20 = arith.addf %17, %19 : vector<8x64xf32>
    %cst_21 = arith.constant 0.000000e+00 : f32
    %21 = vector.broadcast %cst_21 : f32 to vector<8x64xf32>
    %22 = arith.maximumf %20, %21 : vector<8x64xf32>
    %c0_22 = arith.constant 0 : index
    %c0_23 = arith.constant 0 : index
    %23 = vector.load %arg10[%c0_22, %c0_23] : memref<1x64xf32, #tpu.memory_space<vmem>>, vector<1x64xf32>
    %cst_24 = arith.constant dense<0.000000e+00> : vector<1x8xf32>
    %24 = tpu.matmul %23, %22, %cst_24 {dimension_numbers = #tpu.dot_dimension_numbers<[1], [1], [0], [0], [0, 0, 1, 0], [], []>} : vector<1x64xf32>, vector<8x64xf32>, vector<1x8xf32> -> vector<1x8xf32>
    %c0_25 = arith.constant 0 : index
    %c0_26 = arith.constant 0 : index
    %25 = vector.load %arg11[%c0_25, %c0_26] : memref<1x1xf32, #tpu.memory_space<vmem>>, vector<1x1xf32>
    %26 = vector.broadcast %25 : vector<1x1xf32> to vector<1x8xf32>
    %27 = arith.addf %24, %26 : vector<1x8xf32>
    %c0_27 = arith.constant 0 : index
    %c0_28 = arith.constant 0 : index
    %28 = vector.load %arg12[%c0_27, %c0_28] : memref<1x8xf32, #tpu.memory_space<vmem>>, vector<1x8xf32>
    tpu.vector_store %arg12[%c0_27, %c0_28], %27 {strides = array<i32>} : memref<1x8xf32, #tpu.memory_space<vmem>>, vector<1x8xf32>,
    return
  }
  func.func @transform_0(%arg0: i32) -> (i32, i32) {
    %c0_i32 = arith.constant 0 : i32
    %c0_i32_0 = arith.constant 0 : i32
    return %arg0, %c0_i32 : i32, i32
  }
  func.func @transform_1(%arg0: i32) -> (i32, i32) {
    %c0_i32 = arith.constant 0 : i32
    %c0_i32_0 = arith.constant 0 : i32
    return %arg0, %c0_i32 : i32, i32
  }
  func.func @transform_2(%arg0: i32) -> (i32, i32) {
    %c0_i32 = arith.constant 0 : i32
    %c0_i32_0 = arith.constant 0 : i32
    return %arg0, %c0_i32 : i32, i32
  }
  func.func @transform_3(%arg0: i32) -> (i32, i32) {
    %c0_i32 = arith.constant 0 : i32
    %c0_i32_0 = arith.constant 0 : i32
    %c0_i32_1 = arith.constant 0 : i32
    return %c0_i32, %c0_i32_0 : i32, i32
  }
  func.func @transform_4(%arg0: i32) -> (i32, i32) {
    %c0_i32 = arith.constant 0 : i32
    %c0_i32_0 = arith.constant 0 : i32
    %c0_i32_1 = arith.constant 0 : i32
    return %c0_i32, %c0_i32_0 : i32, i32
  }
  func.func @transform_5(%arg0: i32) -> (i32, i32) {
    %c0_i32 = arith.constant 0 : i32
    %c0_i32_0 = arith.constant 0 : i32
    %c0_i32_1 = arith.constant 0 : i32
    return %c0_i32, %c0_i32_0 : i32, i32
  }
  func.func @transform_6(%arg0: i32) -> (i32, i32) {
    %c0_i32 = arith.constant 0 : i32
    %c0_i32_0 = arith.constant 0 : i32
    %c0_i32_1 = arith.constant 0 : i32
    return %c0_i32, %c0_i32_0 : i32, i32
  }
  func.func @transform_7(%arg0: i32) -> (i32, i32) {
    %c0_i32 = arith.constant 0 : i32
    %c0_i32_0 = arith.constant 0 : i32
    %c0_i32_1 = arith.constant 0 : i32
    return %c0_i32, %c0_i32_0 : i32, i32
  }
  func.func @transform_8(%arg0: i32) -> (i32, i32) {
    %c0_i32 = arith.constant 0 : i32
    %c0_i32_0 = arith.constant 0 : i32
    %c0_i32_1 = arith.constant 0 : i32
    return %c0_i32, %c0_i32_0 : i32, i32
  }
  func.func @transform_9(%arg0: i32) -> (i32, i32) {
    %c0_i32 = arith.constant 0 : i32
    %c0_i32_0 = arith.constant 0 : i32
    %c0_i32_1 = arith.constant 0 : i32
    return %c0_i32, %c0_i32_0 : i32, i32
  }
  func.func @transform_10(%arg0: i32) -> (i32, i32) {
    %c0_i32 = arith.constant 0 : i32
    %c0_i32_0 = arith.constant 0 : i32
    %c0_i32_1 = arith.constant 0 : i32
    return %c0_i32, %c0_i32_0 : i32, i32
  }
  func.func @transform_11(%arg0: i32) -> (i32, i32) {
    %c0_i32 = arith.constant 0 : i32
    %c0_i32_0 = arith.constant 0 : i32
    return %c0_i32, %arg0 : i32, i32
  }
}

</mosaic_0001>

<bundles_post_ra>
// kernel: tpu_custom_call.1
= control target key start
LH: loop header
LB: loop body
LE: loop exit
PB: predicated region body
PF: predicated region fallthrough
CT: control target
= control target key end

     0   :  { %s412_s0 = inlined_call_operand.vmem [shape: f32[8,4], index: 0, kind: input, shape index: {}]   ;;  %s413_s1 = inlined_call_operand.vmem [shape: f32[8,2], index: 1, kind: input, shape index: {}]   ;;  %s414_s2 = inlined_call_operand.vmem [shape: f32[8,4], index: 2, kind: input, shape index: {}]   ;;  %s415_s3 = inlined_call_operand.vmem [shape: f32[4,64], index: 3, kind: input, shape index: {}]   ;;  %s416_s4 = inlined_call_operand.vmem [shape: f32[2,64], index: 4, kind: input, shape index: {}]   ;;  %s417_s5 = inlined_call_operand.vmem [shape: f32[4,64], index: 5, kind: input, shape index: {}]   ;;  %s418_s6 = inlined_call_operand.vmem [shape: f32[1,64], index: 6, kind: input, shape index: {}]   ;;  %s419_s7 = inlined_call_operand.hbm [shape: f32[64,64], index: 7, kind: input, shape index: {}]   ;;  %s420_s8 = inlined_call_operand.vmem [shape: f32[1,64], index: 8, kind: input, shape index: {}]   ;;  %s421_s9 = inlined_call_operand.vmem [shape: f32[1,64], index: 9, kind: input, shape index: {}]   ;;  %s422_s10 = inlined_call_operand.<no memory space> [shape: f32[1,1], index: 10, kind: input, shape index: {}]   ;;  %s423_s11 = inlined_call_operand.hbm [shape: f32[1,8], index: 11, kind: output, shape index: {}]  }
   0x1   :  { %v16_v0 = vstv %s422_s10 }
   0x2   :  { %17 = vst [vmem:[#allocation2] sm:$0x1] %v16_v0 }
   0x3   :  { %18 = vsyncpa [#allocation4], 0 }
   0x4   :  { %19 = vsyncpa [#allocation5], 0  ;;  %s38_s21 = sshll.u32 %s419_s7, 4  ;;  %s311_s22 = smov [#allocation3]   ;;  %s39_s21 = int_to_ptr.hbm [resolvable:$true] %s38_s21 }
   0x5   :  { %s40_s23 = sshll.u32 %s311_s22, 4  ;;  %s312_s24 = smov 128   ;;  %s41_s23 = int_to_ptr.vmem [resolvable:$true] %s40_s23 }
   0x6   :  { %s313_s25 = smov 8  }
   0x7   :  { %46 = dma.hbm_to_vmem [thread:$0]  %s39_s21, 1024, %s41_s23, [#allocation4], %s312_s24, %s312_s24, %s313_s25  }
   0x8   :  { %307 = dma.done.wait [#allocation4], 1024  }
   0x9   :  { %308 = vsyncadd [#allocation4], 4294966272  ;;  %vm93_vm0 = vcmask 1043456   ;;  %vm65_vm1 = vcmask 1041408   ;;  %vm89_vm2 = vcmask 31744   ;;  %v117_v2 = vld [vmem:[%s414_s2] sm:$0xff] }
   0xa   :  { %v118_v1 = vld [vmem:[%s417_s5] sm:$0xf]  ;;  %vm61_vm3 = vcmask 15360   ;;  %v158_v8 = vld [vmem:[#allocation3 + $0x30] sm:$0xff]  ;;  %v157_v9 = vld [vmem:[#allocation3 + $0x28] sm:$0xff]  ;;  %vm164_vm4 = vcmask 523264  }
   0xb   :  { %v60_v3 = vld [vmem:[%s416_s4] sm:$0x3]  ;;  %246 = vmatpush.msk.msra.mxu2 %vm93_vm0, %v118_v1  ;;  %v154_v12 = vld [vmem:[#allocation3 + $0x10] sm:$0xff]  ;;  %v153_v13 = vld [vmem:[#allocation3 + $0x8] sm:$0xff]  ;;  %v314_v24 = vmov 0   ;;  %s315_s16 = smov [#allocation6]  }
   0xc   :  { %242 = vmatpush.msk.msra.mxu0 %vm65_vm1, %v60_v3  ;;  %v58_v4 = vld [vmem:[%s415_s3] sm:$0xf]  ;;  %247 = vmatmul.msk.f32.vlgmr.msra.gmra.mxu2 %vm89_vm2, %v117_v2  ;;  %s230_s17 = sshll.u32 %s315_s16, 4  ;;  %s232_s20 = sshll.u32 %s423_s11, 4  ;;  %vm223_vm5 = vcmask 57344   ;;  %s231_s17 = int_to_ptr.vmem [resolvable:$true] %s230_s17  ;;  %s233_s20 = int_to_ptr.hbm [resolvable:$true] %s232_s20 }
   0xd   :  { %v59_v5 = vld [vmem:[%s413_s1] sm:$0xff]  ;;  %244 = vmatpush.msk.msra.mxu1 %vm93_vm0, %v58_v4  ;;  %256 = vset.pattern.permute.xlu0 %v314_v24 }
   0xe   :  { %v57_v6 = vld [vmem:[%s412_s0] sm:$0xff]  ;;  %243 = vmatmul.msk.f32.vlgmr.msra.gmra.mxu0 %vm61_vm3, %v59_v5 }
   0xf   :  { %v159_v7 = vld [vmem:[#allocation3 + $0x38] sm:$0xff]  ;;  %245 = vmatmul.msk.f32.vlgmr.msra.gmra.mxu1 %vm89_vm2, %v57_v6  ;;  %v156_v10 = vld [vmem:[#allocation3 + $0x20] sm:$0xff] }
  0x10   :  { %176 = vmatpush.msra.mxu3 %v159_v7  ;;  %v155_v11 = vld [vmem:[#allocation3 + $0x18] sm:$0xff]  ;;  %v152_v14 = vld [vmem:[#allocation3] sm:$0xff] }
  0x11   :  { %v257_v18 = vld [vmem:[%s418_s6] ss:$0 sm:$0xff] }
  0x12   :  { %177 = vmatpush.msra.mxu3 %v158_v8  ;;  %v190_v23 = vld [vmem:[#allocation2] sm:$0x1] }
  0x13   :  { %193 = vperm.xlu0 %256, %v190_v23   ;;  %v258_v25 = vld [vmem:[%s420_s8] ss:$0 sm:$0xff] }
  0x14   :  { %178 = vmatpush.msra.mxu3 %v157_v9  ;;  %v189_v29 = vld [vmem:[%s421_s9] sm:$0x1] }
  0x16   :  { %179 = vmatpush.msra.mxu3 %v156_v10 }
  0x18   :  { %180 = vmatpush.msra.mxu3 %v155_v11 }
  0x1a   :  { %181 = vmatpush.msra.mxu3 %v154_v12 }
  0x1c   :  { %182 = vmatpush.msra.mxu3 %v153_v13 }
  0x1e   :  { %183 = vmatpush.msra.mxu3 %v152_v14 }
  0x85   :  { %v194_v30 = vpop.permute.xlu0 %193 }
  0x86   :  { %v196_v31 = vperm.slane %v194_v30, 0 }
  0x8b   :  { %v86_v15 = vpop.f32.mrf.mxu0 }
  0x8c   :  { %v114_v16 = vpop.f32.mrf.mxu1 }
  0x8d   :  { %v115_v17 = vadd.f32 %v114_v16, %v86_v15 }
  0x8f   :  { %v142_v19 = vpop.f32.mrf.mxu2 }
  0x90   :  { %v145_v20 = vadd.f32 %v142_v19, %v115_v17 }
  0x92   :  { %v150_v21 = vadd.f32 %v257_v18, %v145_v20 }
  0x94   :  { %v151_v22 = vmax.f32 %v150_v21, 0.0 }
  0x96   :  { %248 = vmatmul.msk.f32.vlgmr.msra.gmra.mxu3 %vm164_vm4, %v151_v22 }
 0x119   :  { %v185_v26 = vpop.f32.mrf.mxu3 }
 0x11a   :  { %v186_v27 = vadd.f32 %v258_v25, %v185_v26 }
 0x11c   :  { %v188_v28 = vmax.f32 %v186_v27, 0.0 }
 0x11e   :  { %249 = vmatpush.xpose.msk.msrb.mxu0 %vm164_vm4, %v188_v28 }
 0x121   :  { %250 = vmatmul.msk.f32.vlgmr.msrb.gmra.mxu0 %vm164_vm4, %v189_v29 }
 0x19e   :  { %v220_v32 = vpop.f32.mrf.mxu0 }
 0x19f   :  { %v221_v33 = vadd.f32 %v220_v32, %v196_v31 }
 0x1a1   :  { %224 = vst.msk [vmem:[#allocation6] sm:$0x1] %vm223_vm5, %v221_v33 }
 0x1a2   :  { %235 = dma.vmem_to_hbm [thread:$0]  %s231_s17, 16, %s233_s20, [#allocation5]  }
 0x1a3   :  { %309 = dma.done.wait [#allocation5], 16  }
 0x1a4   :  { %310 = vsyncadd [#allocation5], 4294967280 }
 0x1a5   :  { %240 = vsyncpa [#allocation4], 1 }
 0x1a6   :  { %241 = vsyncpa [#allocation5], 1 }

</bundles_post_ra>
